<compile_context>
chip_gen: v7x
topology: tpu7x:2x2x1
jax: 0.10.0
libtpu: 0.0.40
codegen_flags: <defaults>
</compile_context>

<pallas_src>
import functools

import jax
import jax.numpy as jnp
from jax import lax
from jax.experimental import pallas as pl
from jax.experimental.pallas import tpu as pltpu


def _flash_attn_kernel(q_ref, k_ref, v_ref, o_ref, qs_sc, m_sc, l_sc, acc_sc,
                       *, inv_scale, heads_per_block, head_dim):
    # q_ref/o_ref : (block_q,  group_dim)   input dtype
    # k_ref/v_ref : (block_kv, group_dim)   input dtype
    # qs_sc       : (block_q,  group_dim)   input dtype (pre-scaled q, cached)
    # m_sc/l_sc   : (heads_per_block, block_q, 1)         f32
    # acc_sc      : (heads_per_block, block_q, head_dim)  f32
    ki = pl.program_id(3)

    @pl.when(ki == 0)
    def _init():
        # Hoist the 1/sqrt(emb_dim) scaling out of the KV loop: the q tile is
        # invariant across ki, so scale it once and cache it in VMEM.
        qs_sc[...] = (q_ref[...] * inv_scale).astype(qs_sc.dtype)
        m_sc[...] = jnp.full(m_sc.shape, -jnp.inf, dtype=m_sc.dtype)
        l_sc[...] = jnp.zeros(l_sc.shape, dtype=l_sc.dtype)
        acc_sc[...] = jnp.zeros(acc_sc.shape, dtype=acc_sc.dtype)

    # Small statically-unrolled loop over the heads packed into this lane group.
    # (For head_dim < 128 these lane slices cross vreg tile boundaries; padding
    # head_dim to 128 in the wrapper would remove the relayouts — possible
    # follow-up if the bundle dump shows it binding.)
    for h in range(heads_per_block):
        c0 = h * head_dim
        q = qs_sc[:, c0:c0 + head_dim]               # (bq,  dh), pre-scaled
        k = k_ref[:, c0:c0 + head_dim]               # (bkv, dh)
        v = v_ref[:, c0:c0 + head_dim]               # (bkv, dh)

        # scores (bq, bkv): contract head_dim of q with head_dim of k (no k.T).
        s = lax.dot_general(q, k, (((1,), (1,)), ((), ())),
                            preferred_element_type=jnp.float32)

        m_prev = m_sc[h, :, :]                       # (bq, 1)
        m_new = jnp.maximum(m_prev, jnp.max(s, axis=-1, keepdims=True))
        alpha = jnp.exp(m_prev - m_new)              # rescale for old stats
        p = jnp.exp(s - m_new)                       # (bq, bkv) f32

        l_sc[h, :, :] = alpha * l_sc[h, :, :] + jnp.sum(p, axis=-1, keepdims=True)
        acc_sc[h, :, :] = alpha * acc_sc[h, :, :] + jnp.dot(
            p.astype(v.dtype), v, preferred_element_type=jnp.float32)
        m_sc[h, :, :] = m_new

    @pl.when(ki == pl.num_programs(3) - 1)
    def _finalize():
        # Normalize each head, then emit ONE lane-dense (block_q, group_dim)
        # store instead of per-head sub-128-lane column writes.
        slabs = []
        for h in range(heads_per_block):
            inv_l = 1.0 / l_sc[h, :, :]    # exact; once per q tile, negligible
            slabs.append(acc_sc[h, :, :] * inv_l)
        tile = slabs[0] if len(slabs) == 1 else jnp.concatenate(slabs, axis=-1)
        o_ref[...] = tile.astype(o_ref.dtype)


def _vmem_capacity_bytes():
    """Per-core VMEM capacity; conservative (v7x-sized) fallback off-TPU."""
    try:
        cap = getattr(pltpu.get_tpu_info(), "vmem_capacity_bytes", None)
        if cap:
            return int(cap)
    except Exception:
        pass
    return 64 * 1024 * 1024


def _pick_block(extent, cap):
    """Largest divisor of `extent` <= cap that is a sublane multiple
    (or the full extent, which is always a legal block)."""
    for d in range(min(extent, cap), 0, -1):
        if extent % d == 0 and (d % 8 == 0 or d == extent):
            return d
    return extent


def self_attention_head(queries, keys, values, emb_dim, heads, mask=None,
                        *, block_q=None, block_kv=None):
    """Pallas implementation of SelfAttentionHead.forward (mask is unused)."""
    del mask  # the reference forward accepts `mask` but never applies it
    B, S, E = queries.shape
    assert E == emb_dim and emb_dim % heads == 0
    head_dim = emb_dim // heads

    # Group heads per program so the block's last (lane) dim is a multiple of
    # 128 or the full embedding dim (both satisfy the (8,128) rule and keep
    # loads/stores lane-dense).
    if head_dim % 128 == 0:
        heads_per_block = 1
    else:
        cands = [g for g in range(1, heads + 1)
                 if heads % g == 0 and (g * head_dim) % 128 == 0]
        heads_per_block = cands[0] if cands else heads
    group_dim = heads_per_block * head_dim
    n_groups = heads // heads_per_block

    # ---- generation-aware tiling -------------------------------------------
    vmem_cap = _vmem_capacity_bytes()
    vmem_limit = (vmem_cap // 4) * 3                  # leave ~25% headroom
    big_vmem = vmem_cap >= 96 * 1024 * 1024           # v5e / v6e (128 MiB)

    # block_q is the primary knob: K/V HBM traffic ~ 2*B*S*E*(S/block_q).
    q_target = 1024 if big_vmem else 512
    kv_target = 512 if heads_per_block == 1 else 256
    if block_q is None:
        block_q = _pick_block(S, q_target)
        # v7x megacore: keep >= 2 parallel blocks of work when batch/head
        # parallelism alone cannot feed both TensorCores.
        if B * n_groups < 2 and S // block_q < 2:
            smaller = _pick_block(S, max(1, S // 2))
            if smaller < S:
                block_q = smaller
    if block_kv is None:
        block_kv = _pick_block(S, kv_target)
    assert S % block_q == 0 and S % block_kv == 0

    inv_scale = 1.0 / (float(emb_dim) ** 0.5)   # reference uses emb_dim, not head_dim
    kernel = functools.partial(
        _flash_attn_kernel,
        inv_scale=inv_scale,
        heads_per_block=heads_per_block,
        head_dim=head_dim,
    )

    # Blocks are taken directly from the [B, S, E] layout (no XLA transposes).
    q_spec = pl.BlockSpec((None, block_q, group_dim),
                          lambda b, g, qi, ki: (b, qi, g))
    kv_spec = pl.BlockSpec((None, block_kv, group_dim),
                           lambda b, g, qi, ki: (b, ki, g))
    o_spec = pl.BlockSpec((None, block_q, group_dim),
                          lambda b, g, qi, ki: (b, qi, g))

    grid = (B, n_groups, S // block_q, S // block_kv)

    itemsize = jnp.dtype(queries.dtype).itemsize
    n_q_tiles = S // block_q
    cost = pl.CostEstimate(
        flops=4 * B * heads * S * S * head_dim,
        transcendentals=B * heads * S * S,
        # q read + o write once; K and V re-streamed once per q tile.
        bytes_accessed=B * S * E * (2 + 2 * n_q_tiles) * itemsize,
    )

    return pl.pallas_call(
        kernel,
        out_shape=jax.ShapeDtypeStruct((B, S, E), queries.dtype),
        grid_spec=pltpu.PrefetchScalarGridSpec(
            num_scalar_prefetch=0,
            grid=grid,
            in_specs=[q_spec, kv_spec, kv_spec],
            out_specs=o_spec,
            scratch_shapes=[
                pltpu.VMEM((block_q, group_dim), queries.dtype),               # scaled q
                pltpu.VMEM((heads_per_block, block_q, 1), jnp.float32),        # m
                pltpu.VMEM((heads_per_block, block_q, 1), jnp.float32),        # l
                pltpu.VMEM((heads_per_block, block_q, head_dim), jnp.float32), # acc
            ],
        ),
        compiler_params=pltpu.CompilerParams(
            dimension_semantics=("parallel", "parallel", "parallel", "arbitrary"),
            vmem_limit_bytes=vmem_limit,
        ),
        cost_estimate=cost,
    )(queries, keys, values)


def _reference(queries, keys, values, emb_dim, heads):
    """Pure-JAX reference mirroring the PyTorch loop semantics."""
    B, S, E = queries.shape
    head_dim = emb_dim // heads
    out = jnp.zeros((B, S, E), jnp.float32)
    for i in range(B):
        for h in range(heads):
            s, e = h * head_dim, (h + 1) * head_dim
            q = queries[i, :, s:e].astype(jnp.float32)
            k = keys[i, :, s:e].astype(jnp.float32)
            v = values[i, :, s:e].astype(jnp.float32)
            w = jax.nn.softmax(q @ k.T / (emb_dim ** 0.5), axis=-1)
            out = out.at[i, :, s:e].set(w @ v)
    return out


if __name__ == "__main__":
    emb_dim = 4
    heads = 2
    vocab = 10
    batch, seq_len = 3, 8

    key = jax.random.PRNGKey(0)
    k_emb, k_ids = jax.random.split(key)

    # Deterministic "embedding table" (nn.Embedding(10, emb_dim) ~ N(0, 1)).
    embed_table = jax.random.normal(k_emb, (vocab, emb_dim), dtype=jnp.float32)
    # Token ids kept in-range of the table (the reference script's ids overflow it).
    input_seq = jax.random.randint(k_ids, (batch, seq_len), 0, vocab)

    queries = embed_table[input_seq]  # [B, S, E]
    keys_ = queries
    values = queries

    out = self_attention_head(queries, keys_, values, emb_dim, heads, mask=None)
    out = jax.block_until_ready(out)
    assert out.shape == (batch, seq_len, emb_dim)

    ref = _reference(queries, keys_, values, emb_dim, heads)
    # Tolerance covers TPU MXU default-precision (bf16-rounded) f32 matmuls;
    # structural errors are orders of magnitude larger than this bound.
    err = float(jnp.max(jnp.abs(out.astype(jnp.float32) - ref)))
    assert err < 2e-2, f"max abs err {err}"

    print("KERNEL_OK")
</pallas_src>

<mosaic_0001>
module attributes {stable_mosaic.version = 11 : i64} {
  func.func @_flash_attn_kernel(%arg0: i32, %arg1: i32, %arg2: i32, %arg3: i32, %arg4: memref<1x8x4xf32, #tpu.memory_space<vmem>>, %arg5: memref<1x8x4xf32, #tpu.memory_space<vmem>>, %arg6: memref<1x8x4xf32, #tpu.memory_space<vmem>>, %arg7: memref<1x8x4xf32, #tpu.memory_space<vmem>>, %arg8: memref<8x4xf32, #tpu.memory_space<vmem>>, %arg9: memref<2x8x1xf32, #tpu.memory_space<vmem>>, %arg10: memref<2x8x1xf32, #tpu.memory_space<vmem>>, %arg11: memref<2x8x2xf32, #tpu.memory_space<vmem>>) attributes {dimension_semantics = [#tpu.dimension_semantics<parallel>, #tpu.dimension_semantics<parallel>, #tpu.dimension_semantics<parallel>, #tpu.dimension_semantics<arbitrary>], iteration_bounds = array<i64: 3, 1, 1, 1>, scalar_prefetch = 0 : i64, scratch_operands = 4 : i64, tpu.core_type = #tpu.core_type<tc>, window_params = [{transform_indices = @transform_0, window_bounds = array<i64: 1, 8, 4>}, {transform_indices = @transform_1, window_bounds = array<i64: 1, 8, 4>}, {transform_indices = @transform_2, window_bounds = array<i64: 1, 8, 4>}, {transform_indices = @transform_3, window_bounds = array<i64: 1, 8, 4>}]} {
    %c0_i32 = arith.constant 0 : i32
    %0 = arith.cmpi eq, %arg3, %c0_i32 : i32
    %1 = arith.extui %0 : i1 to i32
    %c0_i32_0 = arith.constant 0 : i32
    %2 = arith.cmpi ne, %1, %c0_i32_0 : i32
    scf.if %2 {
      %c0_59 = arith.constant 0 : index
      %c0_60 = arith.constant 0 : index
      %c0_61 = arith.constant 0 : index
      %80 = vector.load %arg4[%c0_59, %c0_60, %c0_61] : memref<1x8x4xf32, #tpu.memory_space<vmem>>, vector<1x8x4xf32>
      %81 = vector.shape_cast %80 : vector<1x8x4xf32> to vector<8x4xf32>
      %cst_62 = arith.constant 5.000000e-01 : f32
      %82 = vector.broadcast %cst_62 : f32 to vector<8x4xf32>
      %83 = arith.mulf %81, %82 : vector<8x4xf32>
      %c0_63 = arith.constant 0 : index
      %c0_64 = arith.constant 0 : index
      %84 = vector.load %arg8[%c0_63, %c0_64] : memref<8x4xf32, #tpu.memory_space<vmem>>, vector<8x4xf32>
      tpu.vector_store %arg8[%c0_63, %c0_64], %83 {strides = array<i32>} : memref<8x4xf32, #tpu.memory_space<vmem>>, vector<8x4xf32>,
      %cst_65 = arith.constant 0xFF800000 : f32
      %85 = vector.broadcast %cst_65 : f32 to vector<2x8x1xf32>
      %c0_66 = arith.constant 0 : index
      %c0_67 = arith.constant 0 : index
      %c0_68 = arith.constant 0 : index
      %86 = vector.load %arg9[%c0_66, %c0_67, %c0_68] : memref<2x8x1xf32, #tpu.memory_space<vmem>>, vector<2x8x1xf32>
      tpu.vector_store %arg9[%c0_66, %c0_67, %c0_68], %85 {strides = array<i32>} : memref<2x8x1xf32, #tpu.memory_space<vmem>>, vector<2x8x1xf32>,
      %cst_69 = arith.constant 0.000000e+00 : f32
      %87 = vector.broadcast %cst_69 : f32 to vector<2x8x1xf32>
      %c0_70 = arith.constant 0 : index
      %c0_71 = arith.constant 0 : index
      %c0_72 = arith.constant 0 : index
      %88 = vector.load %arg10[%c0_70, %c0_71, %c0_72] : memref<2x8x1xf32, #tpu.memory_space<vmem>>, vector<2x8x1xf32>
      tpu.vector_store %arg10[%c0_70, %c0_71, %c0_72], %87 {strides = array<i32>} : memref<2x8x1xf32, #tpu.memory_space<vmem>>, vector<2x8x1xf32>,
      %cst_73 = arith.constant 0.000000e+00 : f32
      %89 = vector.broadcast %cst_73 : f32 to vector<2x8x2xf32>
      %c0_74 = arith.constant 0 : index
      %c0_75 = arith.constant 0 : index
      %c0_76 = arith.constant 0 : index
      %90 = vector.load %arg11[%c0_74, %c0_75, %c0_76] : memref<2x8x2xf32, #tpu.memory_space<vmem>>, vector<2x8x2xf32>
      tpu.vector_store %arg11[%c0_74, %c0_75, %c0_76], %89 {strides = array<i32>} : memref<2x8x2xf32, #tpu.memory_space<vmem>>, vector<2x8x2xf32>,
    } else {
    }
    %c0 = arith.constant 0 : index
    %c0_1 = arith.constant 0 : index
    %3 = vector.load %arg8[%c0, %c0_1] : memref<8x4xf32, #tpu.memory_space<vmem>>, vector<8x2xf32>
    %c0_2 = arith.constant 0 : index
    %c0_3 = arith.constant 0 : index
    %c0_4 = arith.constant 0 : index
    %4 = vector.load %arg5[%c0_2, %c0_3, %c0_4] : memref<1x8x4xf32, #tpu.memory_space<vmem>>, vector<1x8x2xf32>
    %5 = vector.shape_cast %4 : vector<1x8x2xf32> to vector<8x2xf32>
    %c0_5 = arith.constant 0 : index
    %c0_6 = arith.constant 0 : index
    %c0_7 = arith.constant 0 : index
    %6 = vector.load %arg6[%c0_5, %c0_6, %c0_7] : memref<1x8x4xf32, #tpu.memory_space<vmem>>, vector<1x8x2xf32>
    %7 = vector.shape_cast %6 : vector<1x8x2xf32> to vector<8x2xf32>
    %cst = arith.constant dense<0.000000e+00> : vector<8x8xf32>
    %8 = tpu.matmul %3, %5, %cst {dimension_numbers = #tpu.dot_dimension_numbers<[1], [1], [0], [0], [0, 0, 1, 0], [], []>} : vector<8x2xf32>, vector<8x2xf32>, vector<8x8xf32> -> vector<8x8xf32>
    %c0_8 = arith.constant 0 : index
    %c0_9 = arith.constant 0 : index
    %c0_10 = arith.constant 0 : index
    %9 = vector.load %arg9[%c0_8, %c0_9, %c0_10] : memref<2x8x1xf32, #tpu.memory_space<vmem>>, vector<1x8x1xf32>
    %10 = vector.shape_cast %9 : vector<1x8x1xf32> to vector<8x1xf32>
    %cst_11 = arith.constant dense<0xFF800000> : vector<8xf32>
    %11 = vector.multi_reduction <maximumf>, %8, %cst_11 [1] : vector<8x8xf32> to vector<8xf32>
    %12 = vector.shape_cast %11 : vector<8xf32> to vector<8x1xf32>
    %13 = arith.maximumf %10, %12 : vector<8x1xf32>
    %14 = arith.subf %10, %13 : vector<8x1xf32>
    %15 = math.exp %14 : vector<8x1xf32>
    %16 = vector.broadcast %13 : vector<8x1xf32> to vector<8x8xf32>
    %17 = arith.subf %8, %16 : vector<8x8xf32>
    %18 = math.exp %17 : vector<8x8xf32>
    %c0_12 = arith.constant 0 : index
    %c0_13 = arith.constant 0 : index
    %c0_14 = arith.constant 0 : index
    %19 = vector.load %arg10[%c0_12, %c0_13, %c0_14] : memref<2x8x1xf32, #tpu.memory_space<vmem>>, vector<1x8x1xf32>
    %20 = vector.shape_cast %19 : vector<1x8x1xf32> to vector<8x1xf32>
    %21 = arith.mulf %15, %20 : vector<8x1xf32>
    %cst_15 = arith.constant dense<0.000000e+00> : vector<8xf32>
    %22 = vector.multi_reduction <add>, %18, %cst_15 [1] : vector<8x8xf32> to vector<8xf32>
    %23 = vector.shape_cast %22 : vector<8xf32> to vector<8x1xf32>
    %24 = arith.addf %21, %23 : vector<8x1xf32>
    %c0_16 = arith.constant 0 : index
    %c0_17 = arith.constant 0 : index
    %c0_18 = arith.constant 0 : index
    %25 = vector.load %arg10[%c0_16, %c0_17, %c0_18] : memref<2x8x1xf32, #tpu.memory_space<vmem>>, vector<1x8x1xf32>
    %26 = vector.shape_cast %25 : vector<1x8x1xf32> to vector<8x1xf32>
    %27 = vector.shape_cast %24 : vector<8x1xf32> to vector<1x8x1xf32>
    tpu.vector_store %arg10[%c0_16, %c0_17, %c0_18], %27 {strides = array<i32>} : memref<2x8x1xf32, #tpu.memory_space<vmem>>, vector<1x8x1xf32>,
    %c0_19 = arith.constant 0 : index
    %c0_20 = arith.constant 0 : index
    %c0_21 = arith.constant 0 : index
    %28 = vector.load %arg11[%c0_19, %c0_20, %c0_21] : memref<2x8x2xf32, #tpu.memory_space<vmem>>, vector<1x8x2xf32>
    %29 = vector.shape_cast %28 : vector<1x8x2xf32> to vector<8x2xf32>
    %30 = vector.broadcast %15 : vector<8x1xf32> to vector<8x2xf32>
    %31 = arith.mulf %30, %29 : vector<8x2xf32>
    %cst_22 = arith.constant dense<0.000000e+00> : vector<8x2xf32>
    %32 = tpu.matmul %18, %7, %cst_22 {dimension_numbers = #tpu.dot_dimension_numbers<[1], [0], [0], [1], [0, 0, 1, 1], [], []>} : vector<8x8xf32>, vector<8x2xf32>, vector<8x2xf32> -> vector<8x2xf32>
    %33 = arith.addf %31, %32 : vector<8x2xf32>
    %c0_23 = arith.constant 0 : index
    %c0_24 = arith.constant 0 : index
    %c0_25 = arith.constant 0 : index
    %34 = vector.load %arg11[%c0_23, %c0_24, %c0_25] : memref<2x8x2xf32, #tpu.memory_space<vmem>>, vector<1x8x2xf32>
    %35 = vector.shape_cast %34 : vector<1x8x2xf32> to vector<8x2xf32>
    %36 = vector.shape_cast %33 : vector<8x2xf32> to vector<1x8x2xf32>
    tpu.vector_store %arg11[%c0_23, %c0_24, %c0_25], %36 {strides = array<i32>} : memref<2x8x2xf32, #tpu.memory_space<vmem>>, vector<1x8x2xf32>,
    %c0_26 = arith.constant 0 : index
    %c0_27 = arith.constant 0 : index
    %c0_28 = arith.constant 0 : index
    %37 = vector.load %arg9[%c0_26, %c0_27, %c0_28] : memref<2x8x1xf32, #tpu.memory_space<vmem>>, vector<1x8x1xf32>
    %38 = vector.shape_cast %37 : vector<1x8x1xf32> to vector<8x1xf32>
    %39 = vector.shape_cast %13 : vector<8x1xf32> to vector<1x8x1xf32>
    tpu.vector_store %arg9[%c0_26, %c0_27, %c0_28], %39 {strides = array<i32>} : memref<2x8x1xf32, #tpu.memory_space<vmem>>, vector<1x8x1xf32>,
    %c0_29 = arith.constant 0 : index
    %c2 = arith.constant 2 : index
    %40 = vector.load %arg8[%c0_29, %c2] : memref<8x4xf32, #tpu.memory_space<vmem>>, vector<8x2xf32>
    %c0_30 = arith.constant 0 : index
    %c0_31 = arith.constant 0 : index
    %c2_32 = arith.constant 2 : index
    %41 = vector.load %arg5[%c0_30, %c0_31, %c2_32] : memref<1x8x4xf32, #tpu.memory_space<vmem>>, vector<1x8x2xf32>
    %42 = vector.shape_cast %41 : vector<1x8x2xf32> to vector<8x2xf32>
    %c0_33 = arith.constant 0 : index
    %c0_34 = arith.constant 0 : index
    %c2_35 = arith.constant 2 : index
    %43 = vector.load %arg6[%c0_33, %c0_34, %c2_35] : memref<1x8x4xf32, #tpu.memory_space<vmem>>, vector<1x8x2xf32>
    %44 = vector.shape_cast %43 : vector<1x8x2xf32> to vector<8x2xf32>
    %cst_36 = arith.constant dense<0.000000e+00> : vector<8x8xf32>
    %45 = tpu.matmul %40, %42, %cst_36 {dimension_numbers = #tpu.dot_dimension_numbers<[1], [1], [0], [0], [0, 0, 1, 0], [], []>} : vector<8x2xf32>, vector<8x2xf32>, vector<8x8xf32> -> vector<8x8xf32>
    %c1 = arith.constant 1 : index
    %c0_37 = arith.constant 0 : index
    %c0_38 = arith.constant 0 : index
    %46 = vector.load %arg9[%c1, %c0_37, %c0_38] : memref<2x8x1xf32, #tpu.memory_space<vmem>>, vector<1x8x1xf32>
    %47 = vector.shape_cast %46 : vector<1x8x1xf32> to vector<8x1xf32>
    %cst_39 = arith.constant dense<0xFF800000> : vector<8xf32>
    %48 = vector.multi_reduction <maximumf>, %45, %cst_39 [1] : vector<8x8xf32> to vector<8xf32>
    %49 = vector.shape_cast %48 : vector<8xf32> to vector<8x1xf32>
    %50 = arith.maximumf %47, %49 : vector<8x1xf32>
    %51 = arith.subf %47, %50 : vector<8x1xf32>
    %52 = math.exp %51 : vector<8x1xf32>
    %53 = vector.broadcast %50 : vector<8x1xf32> to vector<8x8xf32>
    %54 = arith.subf %45, %53 : vector<8x8xf32>
    %55 = math.exp %54 : vector<8x8xf32>
    %c1_40 = arith.constant 1 : index
    %c0_41 = arith.constant 0 : index
    %c0_42 = arith.constant 0 : index
    %56 = vector.load %arg10[%c1_40, %c0_41, %c0_42] : memref<2x8x1xf32, #tpu.memory_space<vmem>>, vector<1x8x1xf32>
    %57 = vector.shape_cast %56 : vector<1x8x1xf32> to vector<8x1xf32>
    %58 = arith.mulf %52, %57 : vector<8x1xf32>
    %cst_43 = arith.constant dense<0.000000e+00> : vector<8xf32>
    %59 = vector.multi_reduction <add>, %55, %cst_43 [1] : vector<8x8xf32> to vector<8xf32>
    %60 = vector.shape_cast %59 : vector<8xf32> to vector<8x1xf32>
    %61 = arith.addf %58, %60 : vector<8x1xf32>
    %c1_44 = arith.constant 1 : index
    %c0_45 = arith.constant 0 : index
    %c0_46 = arith.constant 0 : index
    %62 = vector.load %arg10[%c1_44, %c0_45, %c0_46] : memref<2x8x1xf32, #tpu.memory_space<vmem>>, vector<1x8x1xf32>
    %63 = vector.shape_cast %62 : vector<1x8x1xf32> to vector<8x1xf32>
    %64 = vector.shape_cast %61 : vector<8x1xf32> to vector<1x8x1xf32>
    tpu.vector_store %arg10[%c1_44, %c0_45, %c0_46], %64 {strides = array<i32>} : memref<2x8x1xf32, #tpu.memory_space<vmem>>, vector<1x8x1xf32>,
    %c1_47 = arith.constant 1 : index
    %c0_48 = arith.constant 0 : index
    %c0_49 = arith.constant 0 : index
    %65 = vector.load %arg11[%c1_47, %c0_48, %c0_49] : memref<2x8x2xf32, #tpu.memory_space<vmem>>, vector<1x8x2xf32>
    %66 = vector.shape_cast %65 : vector<1x8x2xf32> to vector<8x2xf32>
    %67 = vector.broadcast %52 : vector<8x1xf32> to vector<8x2xf32>
    %68 = arith.mulf %67, %66 : vector<8x2xf32>
    %cst_50 = arith.constant dense<0.000000e+00> : vector<8x2xf32>
    %69 = tpu.matmul %55, %44, %cst_50 {dimension_numbers = #tpu.dot_dimension_numbers<[1], [0], [0], [1], [0, 0, 1, 1], [], []>} : vector<8x8xf32>, vector<8x2xf32>, vector<8x2xf32> -> vector<8x2xf32>
    %70 = arith.addf %68, %69 : vector<8x2xf32>
    %c1_51 = arith.constant 1 : index
    %c0_52 = arith.constant 0 : index
    %c0_53 = arith.constant 0 : index
    %71 = vector.load %arg11[%c1_51, %c0_52, %c0_53] : memref<2x8x2xf32, #tpu.memory_space<vmem>>, vector<1x8x2xf32>
    %72 = vector.shape_cast %71 : vector<1x8x2xf32> to vector<8x2xf32>
    %73 = vector.shape_cast %70 : vector<8x2xf32> to vector<1x8x2xf32>
    tpu.vector_store %arg11[%c1_51, %c0_52, %c0_53], %73 {strides = array<i32>} : memref<2x8x2xf32, #tpu.memory_space<vmem>>, vector<1x8x2xf32>,
    %c1_54 = arith.constant 1 : index
    %c0_55 = arith.constant 0 : index
    %c0_56 = arith.constant 0 : index
    %74 = vector.load %arg9[%c1_54, %c0_55, %c0_56] : memref<2x8x1xf32, #tpu.memory_space<vmem>>, vector<1x8x1xf32>
    %75 = vector.shape_cast %74 : vector<1x8x1xf32> to vector<8x1xf32>
    %76 = vector.shape_cast %50 : vector<8x1xf32> to vector<1x8x1xf32>
    tpu.vector_store %arg9[%c1_54, %c0_55, %c0_56], %76 {strides = array<i32>} : memref<2x8x1xf32, #tpu.memory_space<vmem>>, vector<1x8x1xf32>,
    %c0_i32_57 = arith.constant 0 : i32
    %77 = arith.cmpi eq, %arg3, %c0_i32_57 : i32
    %78 = arith.extui %77 : i1 to i32
    %c0_i32_58 = arith.constant 0 : i32
    %79 = arith.cmpi ne, %78, %c0_i32_58 : i32
    scf.if %79 {
      %c0_59 = arith.constant 0 : index
      %c0_60 = arith.constant 0 : index
      %c0_61 = arith.constant 0 : index
      %80 = vector.load %arg10[%c0_59, %c0_60, %c0_61] : memref<2x8x1xf32, #tpu.memory_space<vmem>>, vector<1x8x1xf32>
      %81 = vector.shape_cast %80 : vector<1x8x1xf32> to vector<8x1xf32>
      %cst_62 = arith.constant 1.000000e+00 : f32
      %82 = vector.broadcast %cst_62 : f32 to vector<8x1xf32>
      %83 = arith.divf %82, %81 : vector<8x1xf32>
      %c0_63 = arith.constant 0 : index
      %c0_64 = arith.constant 0 : index
      %c0_65 = arith.constant 0 : index
      %84 = vector.load %arg11[%c0_63, %c0_64, %c0_65] : memref<2x8x2xf32, #tpu.memory_space<vmem>>, vector<1x8x2xf32>
      %85 = vector.shape_cast %84 : vector<1x8x2xf32> to vector<8x2xf32>
      %86 = vector.broadcast %83 : vector<8x1xf32> to vector<8x2xf32>
      %87 = arith.mulf %85, %86 : vector<8x2xf32>
      %c1_66 = arith.constant 1 : index
      %c0_67 = arith.constant 0 : index
      %c0_68 = arith.constant 0 : index
      %88 = vector.load %arg10[%c1_66, %c0_67, %c0_68] : memref<2x8x1xf32, #tpu.memory_space<vmem>>, vector<1x8x1xf32>
      %89 = vector.shape_cast %88 : vector<1x8x1xf32> to vector<8x1xf32>
      %cst_69 = arith.constant 1.000000e+00 : f32
      %90 = vector.broadcast %cst_69 : f32 to vector<8x1xf32>
      %91 = arith.divf %90, %89 : vector<8x1xf32>
      %c1_70 = arith.constant 1 : index
      %c0_71 = arith.constant 0 : index
      %c0_72 = arith.constant 0 : index
      %92 = vector.load %arg11[%c1_70, %c0_71, %c0_72] : memref<2x8x2xf32, #tpu.memory_space<vmem>>, vector<1x8x2xf32>
      %93 = vector.shape_cast %92 : vector<1x8x2xf32> to vector<8x2xf32>
      %94 = vector.broadcast %91 : vector<8x1xf32> to vector<8x2xf32>
      %95 = arith.mulf %93, %94 : vector<8x2xf32>
      %96 = tpu.concatenate %87, %95 in 1 : vector<8x2xf32>, vector<8x2xf32> -> vector<8x4xf32>
      %c0_73 = arith.constant 0 : index
      %c0_74 = arith.constant 0 : index
      %c0_75 = arith.constant 0 : index
      %97 = vector.load %arg7[%c0_73, %c0_74, %c0_75] : memref<1x8x4xf32, #tpu.memory_space<vmem>>, vector<1x8x4xf32>
      %98 = vector.shape_cast %97 : vector<1x8x4xf32> to vector<8x4xf32>
      %99 = vector.shape_cast %96 : vector<8x4xf32> to vector<1x8x4xf32>
      tpu.vector_store %arg7[%c0_73, %c0_74, %c0_75], %99 {strides = array<i32>} : memref<1x8x4xf32, #tpu.memory_space<vmem>>, vector<1x8x4xf32>,
    } else {
    }
    return
  }
  func.func @transform_0(%arg0: i32, %arg1: i32, %arg2: i32, %arg3: i32) -> (i32, i32, i32) {
    %c0_i32 = arith.constant 0 : i32
    return %arg0, %arg2, %arg1 : i32, i32, i32
  }
  func.func @transform_1(%arg0: i32, %arg1: i32, %arg2: i32, %arg3: i32) -> (i32, i32, i32) {
    %c0_i32 = arith.constant 0 : i32
    return %arg0, %arg3, %arg1 : i32, i32, i32
  }
  func.func @transform_2(%arg0: i32, %arg1: i32, %arg2: i32, %arg3: i32) -> (i32, i32, i32) {
    %c0_i32 = arith.constant 0 : i32
    return %arg0, %arg3, %arg1 : i32, i32, i32
  }
  func.func @transform_3(%arg0: i32, %arg1: i32, %arg2: i32, %arg3: i32) -> (i32, i32, i32) {
    %c0_i32 = arith.constant 0 : i32
    return %arg0, %arg2, %arg1 : i32, i32, i32
  }
}

</mosaic_0001>

<bundles_post_ra>
// kernel: tpu_custom_call.1
= control target key start
LH: loop header
LB: loop body
LE: loop exit
PB: predicated region body
PF: predicated region fallthrough
CT: control target
= control target key end

     0   :  { %s1006_s12 = smov 0   ;;  %s1008_s13 = smov 0   ;;  %s1080_s0 = inlined_call_operand.vmem [shape: f32[3,8,4], index: 0, kind: input, shape index: {}]   ;;  %s1081_s1 = inlined_call_operand.vmem [shape: f32[3,8,4], index: 1, kind: input, shape index: {}]   ;;  %s1082_s2 = inlined_call_operand.vmem [shape: f32[3,8,4], index: 2, kind: input, shape index: {}]   ;;  %s1083_s3 = inlined_call_operand.vmem [shape: f32[3,8,4], index: 3, kind: output, shape index: {}]  }
   0x1   :  { %s1010_s14 = smov 0  }
   0x2 LB: > { %s39_s15 = sadd.s32 1, %s974_s13  ;;  %p871_p0 = scmp.ge.s32.totalorder %s978_s14, 1  ;;  %s978_s14 = sphi %s1010_s14, %s13_s14   ;;  %s974_s13 = sphi %s1008_s13, %s1085_s13   ;;  %s970_s12 = sphi %s1006_s12, %s1084_s12  }
   0x3   : > { %p41_p1 = scmp.ge.s32.totalorder %s39_s15, 3  ;;  %p214_p2 = scmp.lt.s32.totalorder %s978_s14, 4 }
   0x5   : > { %s1087_s15 = smov (%p41_p1, %s39_s15), 0  ;;  %p215_p3 = pnand %p871_p0, %p214_p2 }
   0x6   : > { %p268_p4 = scmp.lt.s32.totalorder (!%p215_p3), %s970_s12, 2  ;;  %vm321_vm0 = vcmask (!%p215_p3), 15360   ;;  %v980_v0 = vmov (!%p215_p3), 0.0   ;;  %vm981_vm1 = vmmov (!%p215_p3), 0   ;;  %vm314_vm2 = vcmask (!%p215_p3), 31744   ;;  %s984_s23 = smov (!%p215_p3), 126  }
   0x7   : > { %218 = sbr.rel (%p215_p3) target bundleno = 1443 (0x5a3), region = 32  ;;  %892 = vmatprep.subr.mxu0 (!%p215_p3), %v980_v0  ;;  %322 = vst.msk [vmem:[#allocation5] sm:$0xff] (!%p215_p3), %vm321_vm0, %v980_v0  ;;  %323 = vst.msk [vmem:[#allocation5 + $0x8] sm:$0xff] (!%p215_p3), %vm321_vm0, %v980_v0  ;;  %894 = vmatprep.mubr.msk.f32.mxu0 (!%p215_p3), %vm981_vm1, %v980_v0  ;;  %vm316_vm3 = vcmask (!%p215_p3), 7168   ;;  %v982_v5 = vmov (!%p215_p3), -inf   ;;  %vm405_vm4 = vcmask (!%p215_p3), 64512  }
   0x8   : > { %897 = vmatprep.subr.mxu1 (!%p215_p3), %v980_v0  ;;  %899 = vmatprep.mubr.msk.f32.mxu1 (!%p215_p3), %vm981_vm1, %v980_v0  ;;  %317 = vst.msk [vmem:[#allocation3] sm:$0xff] (!%p215_p3), %vm316_vm3, %v982_v5  ;;  %318 = vst.msk [vmem:[#allocation3 + $0x8] sm:$0xff] (!%p215_p3), %vm316_vm3, %v982_v5  ;;  %v983_v9 = vmov (!%p215_p3), 0   ;;  %s985_s27 = smov (!%p215_p3), 2  }
   0x9   : > { %319 = vst.msk [vmem:[#allocation4] sm:$0xff] (!%p215_p3), %vm316_vm3, %v980_v0  ;;  %320 = vst.msk [vmem:[#allocation4 + $0x8] sm:$0xff] (!%p215_p3), %vm316_vm3, %v980_v0  ;;  %942 = vset.pattern.permute.xlu0 (!%p215_p3), %v983_v9  ;;  %943 = vset.pattern.permute.xlu1 (!%p215_p3), %v983_v9 }
   0xe   : > { %s1089_s12 = smov (!%p268_p4, %s970_s12), 2  ;;  %v429_v52 = vld [vmem:[#allocation5] sm:$0xff]  ;;  %v621_v58 = vld [vmem:[#allocation5 + $0x8] sm:$0xff] }
   0xf   : > { %s1028_s16 = sshll.u32 %s1089_s12, 3  ;;  %v404_v10 = vld [vmem:[#allocation3] sm:$0xff]  ;;  %v596_v26 = vld [vmem:[#allocation3 + $0x8] sm:$0xff] }
  0x10   : > { %s277_s19 = scalar_lea.vmem %s1080_s0, %s1028_s16  ;;  %s287_s22 = scalar_lea.vmem %s1081_s1, %s1028_s16  ;;  %v421_v41 = vld [vmem:[#allocation4] sm:$0xff]  ;;  %v613_v47 = vld [vmem:[#allocation4 + $0x8] sm:$0xff] }
  0x11   : > { %v312_v1 = vld [vmem:[%s277_s19] sm:$0xff]  ;;  %s297_s26 = scalar_lea.vmem %s1082_s2, %s1028_s16  ;;  %s307_s30 = scalar_lea.vmem %s1083_s3, %s1028_s16 }
  0x12   : > { %v325_v2 = vld [vmem:[%s287_s22] sm:$0xff]  ;;  %v313_v3 = vmul.f32 0.5, %v312_v1 }
  0x13   : > { %893 = vmatpush3.xpose.msk.msra.mxu0 %vm321_vm0, %v325_v2  ;;  %519 = vrot.lane.b32.xlu1 %v325_v2, %s984_s23  ;;  %v326_v14 = vld [vmem:[%s297_s26] sm:$0xff] }
  0x14   : > { %907 = vmatprep.subr.mxu0 %v980_v0  ;;  %315 = vst.msk [vmem:[#allocation2] sm:$0xff] %vm314_vm2, %v313_v3  ;;  %898 = vmatpush3.msra.mxu1 %v326_v14 }
  0x15   : > { %902 = vmatprep.subr.mxu1 %v980_v0 }
  0x1b   : > { %v324_v4 = vld [vmem:[#allocation2] sm:$0xff] }
  0x1c   : > { %895 = vmatmul.mubr.msk.f32.vlgmr.msra.gmra.mrb[0].mxu0 %vm321_vm0, %v324_v4  ;;  %516 = vrot.lane.b32.xlu1 %v324_v4, %s984_s23 }
  0x1d   : > { %909 = vmatprep.mubr.msk.f32.mxu0 %vm981_vm1, %v980_v0 }
  0x85   : > { %v520_v18 = vpop.permute.xlu1 %519 }
  0x8e   : > { %v517_v20 = vpop.permute.xlu1 %516 }
  0xef   : > { %v400_v6 = vpop.f32.mrb[0].mxu0 }
  0xf0   : > { %v896_v7 = vpop.f32.mrb[1].mxu0  ;;  %v406_v8 = vsel %vm405_vm4, %v400_v6, -inf }
  0xf1   : > { %407 = vmax.xlane.f32.xlu0 %v406_v8 }
 0x17e   : > { %v408_v11 = vpop.xlane.xlu0 %407 }
 0x17f   : > { %v409_v12 = vmax.f32 %v404_v10, %v408_v11 }
 0x181   : > { %v410_v13 = vsub.f32 %v404_v10, %v409_v12  ;;  %511 = vst.msk [vmem:[#allocation3] sm:$0xff] %vm316_vm3, %v409_v12  ;;  %415 = vperm.xlu0 %942, %v409_v12  }
 0x183   : > { %v411_v38 = vmul.f32 1.442695, %v410_v13 }
 0x185   : > { %629 = vrot.lane.b32.xlu0 %v326_v14, %s984_s23 }
 0x200   : > { %v416_v15 = vpop.permute.xlu0 %415 }
 0x201   : > { %v418_v16 = vsub.f32 %v400_v6, %v416_v15 }
 0x203   : > { %v419_v17 = vmul.f32 1.442695, %v418_v16 }
 0x204   : > { %v630_v30 = vpop.permute.xlu0 %629 }
 0x205   : > { %944 = vpow2.f32 %v419_v17  ;;  %908 = vmatpush3.msra.mxu0 %v630_v30 }
 0x20f   : > { %v945_v19 = vpop.eup %944 }
 0x210   : > { %900 = vmatmul.mubr.msk.f32.vlgmr.msra.gmra.mrb[0].mxu1 %vm405_vm4, %v945_v19  ;;  %v423_v31 = vsel %vm405_vm4, %v945_v19, 0.0 }
 0x211   : > { %903 = vmatpush3.xpose.msk.msra.mxu1 %vm321_vm0, %v520_v18  ;;  %904 = vmatprep.mubr.msk.f32.mxu1 %vm981_vm1, %v980_v0 }
 0x214   : > { %905 = vmatmul.mubr.msk.f32.vlgmr.msra.gmra.mrb[2].mxu1 %vm321_vm0, %v517_v20 }
 0x2e3   : > { %v505_v21 = vpop.f32.mrb[0].mxu1 }
 0x2e4   : > { %v901_v22 = vpop.f32.mrb[1].mxu1 }
 0x2e7   : > { %v591_v23 = vpop.f32.mrb[2].mxu1 }
 0x2e8   : > { %v906_v24 = vpop.f32.mrb[3].mxu1  ;;  %v597_v25 = vsel %vm405_vm4, %v591_v23, -inf }
 0x2e9   : > { %598 = vmax.xlane.f32.xlu1 %v597_v25 }
 0x376   : > { %v599_v27 = vpop.xlane.xlu1 %598 }
 0x377   : > { %v600_v28 = vmax.f32 %v596_v26, %v599_v27 }
 0x379   : > { %v601_v29 = vsub.f32 %v596_v26, %v600_v28  ;;  %707 = vst.msk [vmem:[#allocation3 + $0x8] sm:$0xff] %vm316_vm3, %v600_v28  ;;  %606 = vperm.xlu1 %943, %v600_v28  }
 0x37b   : > { %v602_v37 = vmul.f32 1.442695, %v601_v29 }
 0x39d   : > { %424 = vadd.xlane.f32.xlu1 %v423_v31 }
 0x3f8   : > { %v607_v32 = vpop.permute.xlu1 %606 }
 0x3f9   : > { %v609_v33 = vsub.f32 %v591_v23, %v607_v32 }
 0x3fb   : > { %v610_v34 = vmul.f32 1.442695, %v609_v33 }
 0x3fd   : > { %946 = vpow2.f32 %v610_v34 }
 0x3fe   : > { %948 = vpow2.f32 %v602_v37 }
 0x3ff   : > { %950 = vpow2.f32 %v411_v38 }
 0x407   : > { %v947_v35 = vpop.eup %946 }
 0x408   : > { %910 = vmatmul.mubr.msk.f32.vlgmr.msra.gmra.mrb[2].mxu0 %vm405_vm4, %v947_v35  ;;  %v615_v36 = vsel %vm405_vm4, %v947_v35, 0.0  ;;  %v949_v39 = vpop.eup %948 }
 0x409   : > { %616 = vadd.xlane.f32.xlu0 %v615_v36  ;;  %v951_v40 = vpop.eup %950  ;;  %v614_v48 = vmul.f32 %v949_v39, %v613_v47 }
 0x40a   : > { %v422_v42 = vmul.f32 %v951_v40, %v421_v41 }
 0x41f   : > { %624 = vperm.xlu0 %942, %v949_v39  }
 0x423   : > { %432 = vperm.xlu0 %942, %v951_v40  }
 0x42a   : > { %v425_v43 = vpop.xlane.xlu1 %424 }
 0x42b   : > { %v426_v44 = vadd.f32 %v425_v43, %v422_v42 }
 0x42d   : > { %428 = vst.msk [vmem:[#allocation4] sm:$0xff] %vm316_vm3, %v426_v44 }
 0x434   : > { %v711_v45 = vld [vmem:[#allocation4] sm:$0xff] }
 0x435   : > { %952 = vrcp.f32 %v711_v45 }
 0x43f   : > { %v953_v46 = vpop.eup %952 }
 0x440   : > { %717 = vperm.xlu0 %942, %v953_v46  }
 0x496   : > { %v617_v49 = vpop.xlane.xlu0 %616 }
 0x497   : > { %v618_v50 = vadd.f32 %v617_v49, %v614_v48 }
 0x499   : > { %619 = vst.msk [vmem:[#allocation4 + $0x8] sm:$0xff] %vm316_vm3, %v618_v50 }
 0x49e   : > { %v625_v51 = vpop.permute.xlu0 %624 }
 0x49f   : > { %v627_v59 = vmul.f32 %v625_v51, %v621_v58 }
 0x4a0   : > { %v721_v53 = vld [vmem:[#allocation4 + $0x8] sm:$0xff] }
 0x4a1   : > { %954 = vrcp.f32 %v721_v53 }
 0x4a2   : > { %v433_v54 = vpop.permute.xlu0 %432 }
 0x4a3   : > { %v435_v55 = vmul.f32 %v433_v54, %v429_v52 }
 0x4a5   : > { %v509_v56 = vadd.f32 %v505_v21, %v435_v55 }
 0x4a7   : > { %510 = vst.msk [vmem:[#allocation5] sm:$0xff] %vm321_vm0, %v509_v56 }
 0x4ab   : > { %v955_v57 = vpop.eup %954 }
 0x4ac   : > { %727 = vperm.xlu1 %943, %v955_v57  }
 0x4ae   : > { %v714_v3 = vld [vmem:[#allocation5] sm:$0xff] }
 0x4bf   : > { %v718_v2 = vpop.permute.xlu0 %717 }
 0x4c0   : > { %v720_v4 = vmul.f32 %v718_v2, %v714_v3 }
 0x4db   : > { %v701_v60 = vpop.f32.mrb[2].mxu0 }
 0x4dc   : > { %v705_v61 = vadd.f32 %v701_v60, %v627_v59  ;;  %v911_v62 = vpop.f32.mrb[3].mxu0 }
 0x4de   : > { %706 = vst.msk [vmem:[#allocation5 + $0x8] sm:$0xff] %vm321_vm0, %v705_v61 }
 0x4e5   : > { %v724_v0 = vld [vmem:[#allocation5 + $0x8] sm:$0xff] }
 0x52b   : > { %v728_v63 = vpop.permute.xlu1 %727 }
 0x52c   : > { %v730_v1 = vmul.f32 %v728_v63, %v724_v0 }
 0x52e   : > { %732 = vrot.lane.b32.xlu0 %v730_v1, %s985_s27 }
 0x5a0   : > { %v733_v5 = vpop.permute.xlu0 %732 }
 0x5a1   : > { %v735_v6 = vsel %vm321_vm0, %v720_v4, %v733_v5 }
 0x5a2   : > { %737 = vst.msk [vmem:[%s307_s30] sm:$0xff] %vm314_vm2, %v735_v6 }
 0x5a3 PF: > { %s13_s14 = sadd.s32 1, %s978_s14   ;;  %s1084_s12 = smov %s974_s13 }
 0x5a4   : > { %p10_p5 = scmp.ge.s32.totalorder %s13_s14, 5   ;;  %s1085_s13 = smov %s1087_s15 }
 0x5a6   :  { %12 = sbr.rel (!%p10_p5) target bundleno = 2 (0x2), region = 79 }

</bundles_post_ra>
